<compile_context>
chip_gen: v6e
topology: v6e:2x2x1
jax: 0.10.0
libtpu: 0.0.40
codegen_flags: <defaults>
</compile_context>

<pallas_src>
import functools

import jax
import jax.numpy as jnp
import numpy as np
from jax import lax
from jax.experimental import pallas as pl
from jax.experimental.pallas import tpu as pltpu


def _conv_block_kernel(x_ref, wband_ref, params_ref, o_ref, lhs_ref,
                       *, KH, H, Ho, ph, WC):
    # x_ref:      (NB, H, W*Cin)            un-padded, channel-packed input images
    # wband_ref:  (KH*W*Cin, Wo*Cout)       fused banded conv weights (BN scale + W-pad folded)
    # params_ref: (2, Wo*Cout)              row 0 = BN shift (tiled over Wo), row 1 = PReLU alpha
    # o_ref:      (NB, Ho, Wo*Cout)         lane-dense packed output
    # lhs_ref:    (NB, Ho, KH*W*Cin) VMEM   im2row-over-H LHS, in compute dtype
    NB = x_ref.shape[0]
    K = KH * WC
    lanes_out = o_ref.shape[2]

    # One-time zeroing of the scratch: the static H-halo rows (zero padding) are never
    # overwritten below, the data rows are rewritten every grid step.
    if ph > 0:
        @pl.when(pl.program_id(0) == 0)
        def _zero_halo():
            lhs_ref[...] = jnp.zeros_like(lhs_ref)

    # im2row over H only: for each kh tap copy the valid input rows of all NB images into
    # the kh-th K block of the LHS.  This is also the single cast to the compute dtype.
    for kh in range(KH):
        lo = max(0, ph - kh)                 # first valid output row for this tap
        hi = min(Ho, ph - kh + H)            # one past last valid output row
        src_lo = lo + kh - ph                # matching input row
        rows = hi - lo
        lhs_ref[:, lo:hi, kh * WC:(kh + 1) * WC] = (
            x_ref[:, src_lo:src_lo + rows, :].astype(lhs_ref.dtype))

    # Single fused MXU matmul: (NB*Ho, KH*W*Cin) @ (KH*W*Cin, Wo*Cout), f32 accumulation.
    lhs = lhs_ref[...].reshape(NB * Ho, K)            # collapsing leading dims: layout-free
    y = jnp.dot(lhs, wband_ref[...], preferred_element_type=jnp.float32)

    # Fused BN shift + per-channel PReLU epilogue (f32 on the VPU), lane-dense store.
    y = y + params_ref[0:1, :]
    y = jnp.where(y > 0, y, params_ref[1:2, :] * y)
    o_ref[...] = y.reshape(NB, Ho, lanes_out).astype(o_ref.dtype)


def prepare_conv_block(weight_oihw, bn_gamma, bn_beta, bn_running_mean, bn_running_var,
                       prelu_alpha, *, W, padding=(0, 0), eps=1e-5,
                       compute_dtype=jnp.float32):
    """Fold eval-mode BN into the conv weights and build the banded (Toeplitz-over-W)
    weight plus the fused epilogue params.

    Call ONCE at model load time (per layer / per input width) and reuse the result for
    every forward call — this is deliberately split out of conv_block_apply.
    """
    Cout, Cin, KH, KW = weight_oihw.shape
    ph, pw = padding
    Wo = W + 2 * pw - KW + 1

    scale = bn_gamma / jnp.sqrt(bn_running_var + eps)              # (Cout,)
    shift = bn_beta - bn_running_mean * scale                      # (Cout,)
    w_hwio = jnp.transpose(weight_oihw, (2, 3, 1, 0))              # (KH, KW, Cin, Cout)
    w_folded = w_hwio * scale[None, None, None, :]

    # Banded weight:
    #   wband[kh*W*Cin + w*Cin + ci, wo*Cout + co] = w_folded[kh, w - wo + pw, ci, co]
    # for valid taps, 0 otherwise (W zero-padding folded into the band).
    # `sel` is a static numpy constant; the einsum itself runs in this prepare step only.
    # TODO(synk): for realistic W, band-tile along Wo*Cout (build only the rows covering
    # each lane chunk's input window) instead of this dense mostly-zero band.
    sel = (np.arange(W)[None, :, None] ==
           (np.arange(Wo)[None, None, :] + np.arange(KW)[:, None, None] - pw)
           ).astype(np.float32)                                    # (KW, W, Wo)
    wband = jnp.einsum('kpw,hkio->hpiwo', jnp.asarray(sel), w_folded)
    wband = wband.reshape(KH * W * Cin, Wo * Cout).astype(compute_dtype)

    # BN shift + PReLU alpha, tiled lane-dense over Wo, fused into one small input.
    params = jnp.stack([jnp.tile(shift, Wo), jnp.tile(prelu_alpha, Wo)],
                       axis=0).astype(jnp.float32)
    return wband, params


def conv_block_apply(x_nchw, wband, params, *, KH, KW, Cout,
                     padding=(0, 0), compute_dtype=jnp.float32):
    """Run the fused Conv+BN+PReLU Pallas kernel on prepared (wband, params)."""
    N, Cin, H, W = x_nchw.shape
    ph, pw = padding
    Ho = H + 2 * ph - KH + 1
    Wo = W + 2 * pw - KW + 1
    WC = W * Cin
    Nout = Wo * Cout
    K = KH * WC
    itemsize = jnp.dtype(compute_dtype).itemsize

    # Lane-dense packed input: channels into the lane axis.
    x_packed = jnp.transpose(x_nchw, (0, 2, 3, 1)).reshape(N, H, WC)

    # ---- choose images-per-step NB: grow matmul M toward 256 rows, stay in VMEM budget.
    target_rows = 256                                   # fills v6e/v7x MXU rows (>=128 for v5e)
    per_image_bytes = (H * WC + Ho * Nout) * 4 + Ho * K * itemsize
    budget_bytes = 8 * 1024 * 1024
    NB = 1
    for cand in range(1, N + 1):
        if N % cand:
            continue
        if cand > 1 and cand * per_image_bytes > budget_bytes:
            break
        NB = cand
        if cand * Ho >= target_rows:
            break
    grid = (N // NB,)
    # TODO(synk): add a second "parallel" grid axis (Ho tiles or lane tiles) so v7x's two
    # TensorCores both get work when N // NB == 1.

    # Explicit VMEM limit: double-buffered blocks + scratch, with headroom, capped at the
    # v6e/v7x scoped default (32 MiB) so it is also safe on v7x's 64 MiB VMEM.
    vmem_bytes = (2 * NB * H * WC * 4
                  + 2 * K * Nout * itemsize
                  + 2 * 2 * Nout * 4
                  + 2 * NB * Ho * Nout * 4
                  + NB * Ho * K * itemsize)
    vmem_limit = int(min(max(2 * vmem_bytes, 4 * 1024 * 1024), 32 * 1024 * 1024))

    kernel = functools.partial(_conv_block_kernel,
                               KH=KH, H=H, Ho=Ho, ph=ph, WC=WC)

    out_packed = pl.pallas_call(
        kernel,
        out_shape=jax.ShapeDtypeStruct((N, Ho, Nout), jnp.float32),
        grid_spec=pltpu.PrefetchScalarGridSpec(
            num_scalar_prefetch=0,
            grid=grid,
            in_specs=[
                pl.BlockSpec((NB, H, WC), lambda g: (g, 0, 0)),
                pl.BlockSpec((K, Nout), lambda g: (0, 0)),
                pl.BlockSpec((2, Nout), lambda g: (0, 0)),
            ],
            out_specs=pl.BlockSpec((NB, Ho, Nout), lambda g: (g, 0, 0)),
            scratch_shapes=[pltpu.VMEM((NB, Ho, K), compute_dtype)],
        ),
        compiler_params=pltpu.CompilerParams(
            dimension_semantics=("parallel",),
            vmem_limit_bytes=vmem_limit),
    )(x_packed, wband, params)

    # (N, Ho, Wo*Cout) -> (N, Ho, Wo, Cout): free reshape; one transpose back to NCHW.
    return jnp.transpose(out_packed.reshape(N, Ho, Wo, Cout), (0, 3, 1, 2))


def conv_block_forward(x_nchw, weight_oihw, bn_gamma, bn_beta,
                       bn_running_mean, bn_running_var, prelu_alpha,
                       *, stride=(1, 1), padding=(0, 0), groups=1, eps=1e-5,
                       compute_dtype=jnp.float32):
    """Conv_block forward. x_nchw: (N, Cin, H, W) float32. Returns (N, Cout, Ho, Wo).

    Set compute_dtype=jnp.bfloat16 on v6e/v7x for 2x MXU throughput (epilogue stays f32);
    keep f32 when validating against tight (1e-4) tolerances.
    """
    assert groups == 1, "only groups=1 implemented"
    assert stride == (1, 1), "only stride=(1,1) implemented"
    # TODO(synk): general stride/groups need strided band construction / per-group matmuls.

    Cout, Cin_w, KH, KW = weight_oihw.shape
    assert Cin_w == x_nchw.shape[1]
    W = x_nchw.shape[3]

    # In real use prepare_conv_block() is hoisted out of the forward path (model load).
    wband, params = prepare_conv_block(
        weight_oihw, bn_gamma, bn_beta, bn_running_mean, bn_running_var, prelu_alpha,
        W=W, padding=padding, eps=eps, compute_dtype=compute_dtype)
    return conv_block_apply(x_nchw, wband, params, KH=KH, KW=KW, Cout=Cout,
                            padding=padding, compute_dtype=compute_dtype)


def _reference_forward(x_nchw, weight_oihw, bn_gamma, bn_beta,
                       bn_running_mean, bn_running_var, prelu_alpha,
                       *, padding=(0, 0), eps=1e-5):
    """Pure-JAX reference (same semantics) for the correctness check."""
    y = lax.conv_general_dilated(
        x_nchw, weight_oihw, window_strides=(1, 1),
        padding=[(padding[0], padding[0]), (padding[1], padding[1])],
        dimension_numbers=("NCHW", "OIHW", "NCHW"))
    g = bn_gamma[None, :, None, None]
    b = bn_beta[None, :, None, None]
    m = bn_running_mean[None, :, None, None]
    v = bn_running_var[None, :, None, None]
    y = (y - m) / jnp.sqrt(v + eps) * g + b
    a = prelu_alpha[None, :, None, None]
    return jnp.where(y > 0, y, a * y)


if __name__ == "__main__":
    # Small deterministic problem: Conv_block(in_c=4, out_c=8, kernel=(3,3), padding=(1,1))
    N, Cin, H, W = 2, 4, 16, 16
    Cout, KH, KW = 8, 3, 3
    padding = (1, 1)

    key = jax.random.PRNGKey(0)
    kx, kw = jax.random.split(key, 2)

    x = jax.random.normal(kx, (N, Cin, H, W), dtype=jnp.float32)
    weight = 0.1 * jax.random.normal(kw, (Cout, Cin, KH, KW), dtype=jnp.float32)

    # Deterministic, non-trivial BN / PReLU parameters.
    bn_gamma = 1.0 + 0.1 * jnp.arange(Cout, dtype=jnp.float32)
    bn_beta = 0.01 * jnp.arange(Cout, dtype=jnp.float32)
    bn_running_mean = 0.05 * jnp.arange(Cout, dtype=jnp.float32)
    bn_running_var = 1.0 + 0.02 * jnp.arange(Cout, dtype=jnp.float32)
    prelu_alpha = jnp.full((Cout,), 0.25, dtype=jnp.float32)  # PyTorch PReLU default init

    out = conv_block_forward(x, weight, bn_gamma, bn_beta,
                             bn_running_mean, bn_running_var, prelu_alpha,
                             stride=(1, 1), padding=padding, groups=1,
                             compute_dtype=jnp.float32)
    out = jax.block_until_ready(out)

    ref = _reference_forward(x, weight, bn_gamma, bn_beta,
                             bn_running_mean, bn_running_var, prelu_alpha,
                             padding=padding)
    np.testing.assert_allclose(np.asarray(out), np.asarray(ref),
                               rtol=1e-4, atol=1e-4)
    print("KERNEL_OK")
</pallas_src>

<mosaic_0001>
module attributes {stable_mosaic.version = 11 : i64} {
  func.func @_conv_block_kernel(%arg0: i32, %arg1: memref<2x16x64xf32, #tpu.memory_space<vmem>>, %arg2: memref<192x128xf32, #tpu.memory_space<vmem>>, %arg3: memref<2x128xf32, #tpu.memory_space<vmem>>, %arg4: memref<2x16x128xf32, #tpu.memory_space<vmem>>, %arg5: memref<2x16x192xf32, #tpu.memory_space<vmem>>) attributes {dimension_semantics = [#tpu.dimension_semantics<parallel>], iteration_bounds = array<i64: 1>, scalar_prefetch = 0 : i64, scratch_operands = 1 : i64, tpu.core_type = #tpu.core_type<tc>, window_params = [{transform_indices = @transform_0, window_bounds = array<i64: 2, 16, 64>}, {pipeline_mode = #tpu.pipeline_mode<synchronous>, transform_indices = @transform_1, window_bounds = array<i64: 192, 128>}, {pipeline_mode = #tpu.pipeline_mode<synchronous>, transform_indices = @transform_2, window_bounds = array<i64: 2, 128>}, {transform_indices = @transform_3, window_bounds = array<i64: 2, 16, 128>}]} {
    %c0_i32 = arith.constant 0 : i32
    %0 = arith.cmpi eq, %arg0, %c0_i32 : i32
    %1 = arith.extui %0 : i1 to i32
    %c0_i32_0 = arith.constant 0 : i32
    %2 = arith.cmpi ne, %1, %c0_i32_0 : i32
    scf.if %2 {
      %cst_28 = arith.constant 0.000000e+00 : f32
      %24 = vector.broadcast %cst_28 : f32 to vector<2x16x192xf32>
      %c0_29 = arith.constant 0 : index
      %c0_30 = arith.constant 0 : index
      %c0_31 = arith.constant 0 : index
      %25 = vector.load %arg5[%c0_29, %c0_30, %c0_31] : memref<2x16x192xf32, #tpu.memory_space<vmem>>, vector<2x16x192xf32>
      tpu.vector_store %arg5[%c0_29, %c0_30, %c0_31], %24 {strides = array<i32>} : memref<2x16x192xf32, #tpu.memory_space<vmem>>, vector<2x16x192xf32>,
    } else {
    }
    %c0 = arith.constant 0 : index
    %c0_1 = arith.constant 0 : index
    %c0_2 = arith.constant 0 : index
    %3 = vector.load %arg1[%c0, %c0_1, %c0_2] : memref<2x16x64xf32, #tpu.memory_space<vmem>>, vector<2x15x64xf32>
    %c0_3 = arith.constant 0 : index
    %c1 = arith.constant 1 : index
    %c0_4 = arith.constant 0 : index
    %4 = vector.load %arg5[%c0_3, %c1, %c0_4] : memref<2x16x192xf32, #tpu.memory_space<vmem>>, vector<2x15x64xf32>
    tpu.vector_store %arg5[%c0_3, %c1, %c0_4], %3 {strides = array<i32>} : memref<2x16x192xf32, #tpu.memory_space<vmem>>, vector<2x15x64xf32>,
    %c0_5 = arith.constant 0 : index
    %c0_6 = arith.constant 0 : index
    %c0_7 = arith.constant 0 : index
    %5 = vector.load %arg1[%c0_5, %c0_6, %c0_7] : memref<2x16x64xf32, #tpu.memory_space<vmem>>, vector<2x16x64xf32>
    %c0_8 = arith.constant 0 : index
    %c0_9 = arith.constant 0 : index
    %c64 = arith.constant 64 : index
    %6 = vector.load %arg5[%c0_8, %c0_9, %c64] : memref<2x16x192xf32, #tpu.memory_space<vmem>>, vector<2x16x64xf32>
    tpu.vector_store %arg5[%c0_8, %c0_9, %c64], %5 {strides = array<i32>} : memref<2x16x192xf32, #tpu.memory_space<vmem>>, vector<2x16x64xf32>,
    %c0_10 = arith.constant 0 : index
    %c1_11 = arith.constant 1 : index
    %c0_12 = arith.constant 0 : index
    %7 = vector.load %arg1[%c0_10, %c1_11, %c0_12] : memref<2x16x64xf32, #tpu.memory_space<vmem>>, vector<2x15x64xf32>
    %c0_13 = arith.constant 0 : index
    %c0_14 = arith.constant 0 : index
    %c128 = arith.constant 128 : index
    %8 = vector.load %arg5[%c0_13, %c0_14, %c128] : memref<2x16x192xf32, #tpu.memory_space<vmem>>, vector<2x15x64xf32>
    tpu.vector_store %arg5[%c0_13, %c0_14, %c128], %7 {strides = array<i32>} : memref<2x16x192xf32, #tpu.memory_space<vmem>>, vector<2x15x64xf32>,
    %c0_15 = arith.constant 0 : index
    %c0_16 = arith.constant 0 : index
    %c0_17 = arith.constant 0 : index
    %9 = vector.load %arg5[%c0_15, %c0_16, %c0_17] : memref<2x16x192xf32, #tpu.memory_space<vmem>>, vector<2x16x192xf32>
    %10 = vector.shape_cast %9 : vector<2x16x192xf32> to vector<32x192xf32>
    %c0_18 = arith.constant 0 : index
    %c0_19 = arith.constant 0 : index
    %11 = vector.load %arg2[%c0_18, %c0_19] : memref<192x128xf32, #tpu.memory_space<vmem>>, vector<192x128xf32>
    %cst = arith.constant dense<0.000000e+00> : vector<32x128xf32>
    %12 = tpu.matmul %10, %11, %cst {dimension_numbers = #tpu.dot_dimension_numbers<[1], [0], [0], [1], [0, 0, 1, 1], [], []>} : vector<32x192xf32>, vector<192x128xf32>, vector<32x128xf32> -> vector<32x128xf32>
    %c0_20 = arith.constant 0 : index
    %c0_21 = arith.constant 0 : index
    %13 = vector.load %arg3[%c0_20, %c0_21] : memref<2x128xf32, #tpu.memory_space<vmem>>, vector<1x128xf32>
    %14 = vector.broadcast %13 : vector<1x128xf32> to vector<32x128xf32>
    %15 = arith.addf %12, %14 : vector<32x128xf32>
    %cst_22 = arith.constant 0.000000e+00 : f32
    %16 = vector.broadcast %cst_22 : f32 to vector<32x128xf32>
    %17 = arith.cmpf ogt, %15, %16 : vector<32x128xf32>
    %c1_23 = arith.constant 1 : index
    %c0_24 = arith.constant 0 : index
    %18 = vector.load %arg3[%c1_23, %c0_24] : memref<2x128xf32, #tpu.memory_space<vmem>>, vector<1x128xf32>
    %19 = vector.broadcast %18 : vector<1x128xf32> to vector<32x128xf32>
    %20 = arith.mulf %19, %15 : vector<32x128xf32>
    %21 = arith.select %17, %15, %20 : vector<32x128xi1>, vector<32x128xf32>
    %22 = vector.shape_cast %21 : vector<32x128xf32> to vector<2x16x128xf32>
    %c0_25 = arith.constant 0 : index
    %c0_26 = arith.constant 0 : index
    %c0_27 = arith.constant 0 : index
    %23 = vector.load %arg4[%c0_25, %c0_26, %c0_27] : memref<2x16x128xf32, #tpu.memory_space<vmem>>, vector<2x16x128xf32>
    tpu.vector_store %arg4[%c0_25, %c0_26, %c0_27], %22 {strides = array<i32>} : memref<2x16x128xf32, #tpu.memory_space<vmem>>, vector<2x16x128xf32>,
    return
  }
  func.func @transform_0(%arg0: i32) -> (i32, i32, i32) {
    %c0_i32 = arith.constant 0 : i32
    %c0_i32_0 = arith.constant 0 : i32
    %c0_i32_1 = arith.constant 0 : i32
    return %arg0, %c0_i32, %c0_i32_0 : i32, i32, i32
  }
  func.func @transform_1(%arg0: i32) -> (i32, i32) {
    %c0_i32 = arith.constant 0 : i32
    %c0_i32_0 = arith.constant 0 : i32
    %c0_i32_1 = arith.constant 0 : i32
    return %c0_i32, %c0_i32_0 : i32, i32
  }
  func.func @transform_2(%arg0: i32) -> (i32, i32) {
    %c0_i32 = arith.constant 0 : i32
    %c0_i32_0 = arith.constant 0 : i32
    %c0_i32_1 = arith.constant 0 : i32
    return %c0_i32, %c0_i32_0 : i32, i32
  }
  func.func @transform_3(%arg0: i32) -> (i32, i32, i32) {
    %c0_i32 = arith.constant 0 : i32
    %c0_i32_0 = arith.constant 0 : i32
    %c0_i32_1 = arith.constant 0 : i32
    return %arg0, %c0_i32, %c0_i32_0 : i32, i32, i32
  }
}

</mosaic_0001>

<bundles_post_ra>
// kernel: tpu_custom_call.1
= control target key start
LH: loop header
LB: loop body
LE: loop exit
PB: predicated region body
PF: predicated region fallthrough
CT: control target
= control target key end

     0   :  { %8 = vsyncpa [#allocation4], 0  ;;  %s538_s0 = inlined_call_operand.hbm [shape: f32[2,16,64], index: 0, kind: input, shape index: {}]   ;;  %s539_s1 = inlined_call_operand.hbm [shape: f32[192,128], index: 1, kind: input, shape index: {}]   ;;  %s540_s2 = inlined_call_operand.vmem [shape: f32[2,128], index: 2, kind: input, shape index: {}]   ;;  %s541_s3 = inlined_call_operand.hbm [shape: f32[2,16,128], index: 3, kind: output, shape index: {}]  }
   0x1   :  { %9 = vsyncpa [#allocation7], 0 }
   0x2   :  { %10 = vsyncpa [#allocation5], 0  ;;  %s415_s12 = smov [#allocation3]  }
   0x3   :  { %s16_s13 = sshll.u32 %s415_s12, 4  ;;  %s17_s13 = int_to_ptr.vmem [resolvable:$true] %s16_s13 }
   0x4   :  { %s357_s14 = scalar_lea.vmem %s17_s13, 512  ;;  %p362_p1 = scmp.lt.s32.totalorder %s17_s13, %s17_s13 }
   0x5   :  { %p358_p0 = scmp.ne.s32.totalorder %s17_s13, %s357_s14  ;;  %p363_p2 = scmp.lt.s32.totalorder %s357_s14, %s357_s14 }
   0x7   :  { %p364_p3 = por %p363_p2, %p362_p1 }
   0x9   :  { %p365_p4 = pnand %p364_p3, %p358_p0 }
   0xb   :  { %368 = shalt.err (!%p365_p4)
}
   0xc   :  { %s416_s15 = smov 128   ;;  %s417_s16 = smov 8  }
   0xd   :  { %22 = dma.hbm_to_vmem [thread:$0]  %s538_s0, 512, %s17_s13, [#allocation4], %s416_s15, %s416_s15, %s417_s16  }
   0xe   :  { %s418_s19 = smov [#allocation6]  }
   0xf   :  { %s28_s20 = sshll.u32 %s418_s19, 4  ;;  %s29_s20 = int_to_ptr.vmem [resolvable:$true] %s28_s20 }
  0x10   :  { %s377_s21 = scalar_lea.vmem %s29_s20, 3072  ;;  %p382_p6 = scmp.lt.s32.totalorder %s29_s20, %s29_s20 }
  0x11   :  { %p378_p5 = scmp.ne.s32.totalorder %s29_s20, %s377_s21  ;;  %p383_p7 = scmp.lt.s32.totalorder %s377_s21, %s377_s21 }
  0x13   :  { %p384_p8 = por %p383_p7, %p382_p6 }
  0x15   :  { %p385_p9 = pnand %p384_p8, %p378_p5 }
  0x17   :  { %388 = shalt.err (!%p385_p9)
}
  0x18   :  { %34 = dma.hbm_to_vmem [thread:$0]  %s539_s1, 3072, %s29_s20, [#allocation7], %s416_s15, %s416_s15, %s417_s16  }
  0x19   :  { %409 = dma.done.wait [#allocation4], 512  }
  0x1a   :  { %410 = vsyncadd [#allocation4], 4294966784 }
  0x1b   :  { %411 = dma.done.wait [#allocation7], 3072  }
  0x1c   :  { %412 = vsyncadd [#allocation7], 4294964224  ;;  %v419_v0 = vmov 0.0   ;;  %vm48_vm0 = vcmask 523264   ;;  %v81_v1 = vld [vmem:[#allocation3] sm:$0xff]  ;;  %v82_v2 = vld [vmem:[#allocation3 + $0x8] sm:$0xff] }
  0x1d   :  { %164 = vmatprep.subr.mxu0 %v419_v0  ;;  %47 = vst [vmem:[#allocation2] sm:$0xff] %v419_v0  ;;  %50 = vst [vmem:[#allocation2 + $0x10] sm:$0xff] %v419_v0  ;;  %294 = vmatprep.subr.mxu1 %v419_v0  ;;  %v83_v3 = vld [vmem:[#allocation3 + $0x10] sm:$0xff]  ;;  %vm75_vm1 = vcmask 523265   ;;  %s420_s0 = smov 64   ;;  %v138_v4 = vld [vmem:[#allocation6 + $0x78] sm:$0xff] }
  0x1e   :  { %52 = vst [vmem:[#allocation2 + $0x20] sm:$0xff] %v419_v0  ;;  %54 = vst [vmem:[#allocation2 + $0x30] sm:$0xff] %v419_v0  ;;  %89 = vrot.lane.b32.xlu0 %v81_v1, %s420_s0  ;;  %91 = vrot.lane.b32.xlu1 %v82_v2, %s420_s0  ;;  %v137_v5 = vld [vmem:[#allocation6 + $0x70] sm:$0xff]  ;;  %v65_v6 = vrot.slane %v81_v1, 7  ;;  %v68_v7 = vrot.slane %v83_v3, 7  ;;  %v84_v8 = vld [vmem:[#allocation3 + $0x18] sm:$0xff] }
  0x1f   :  { %49 = vst.msk [vmem:[#allocation2 + $0x8] sm:$0xff] %vm48_vm0, %v419_v0  ;;  %51 = vst.msk [vmem:[#allocation2 + $0x18] sm:$0xff] %vm48_vm0, %v419_v0  ;;  %165 = vmatpush1.msra.mxu0 %v138_v4  ;;  %318 = vmatpush1.msra.mxu1 %v138_v4  ;;  %v136_v9 = vld [vmem:[#allocation6 + $0x68] sm:$0xff]  ;;  %v135_v10 = vld [vmem:[#allocation6 + $0x60] sm:$0xff]  ;;  %vm64_vm2 = vcmask 1040384   ;;  %vm111_vm3 = vcmask 522240  }
  0x20   :  { %53 = vst.msk [vmem:[#allocation2 + $0x28] sm:$0xff] %vm48_vm0, %v419_v0  ;;  %55 = vst.msk [vmem:[#allocation2 + $0x38] sm:$0xff] %vm48_vm0, %v419_v0  ;;  %166 = vmatprep.subr.mxu0 %v419_v0  ;;  %295 = vmatprep.subr.mxu1 %v419_v0  ;;  %v134_v11 = vld [vmem:[#allocation6 + $0x58] sm:$0xff]  ;;  %v57_v12 = vld [vmem:[#allocation3 + $0x8] sm:$0x7f]  ;;  %vm101_vm4 = vcmask 1048064  }
  0x21   :  { %76 = vst.msk [vmem:[#allocation2] sm:$0xfe] %vm75_vm1, %v65_v6  ;;  %79 = vst.msk [vmem:[#allocation2 + $0x20] sm:$0xfe] %vm75_vm1, %v68_v7  ;;  %167 = vmatpush1.msra.mxu0 %v137_v5  ;;  %319 = vmatpush1.msra.mxu1 %v137_v5  ;;  %v133_v13 = vld [vmem:[#allocation6 + $0x50] sm:$0xff]  ;;  %v66_v14 = vrot.slane %v57_v12, 7 }
  0x22   :  { %93 = vrot.lane.b32.xlu0 %v83_v3, %s420_s0  ;;  %95 = vrot.lane.b32.xlu1 %v84_v8, %s420_s0  ;;  %v59_v15 = vld [vmem:[#allocation3 + $0x18] sm:$0x7f]  ;;  %v106_v17 = vld [vmem:[#allocation3 + $0x1] sm:$0xff]  ;;  %v107_v18 = vld [vmem:[#allocation3 + $0x9] sm:$0x7f] }
  0x23   :  { %168 = vmatprep.subr.mxu0 %v419_v0  ;;  %296 = vmatprep.subr.mxu1 %v419_v0  ;;  %v69_v16 = vrot.slane %v59_v15, 7  ;;  %v108_v19 = vld [vmem:[#allocation3 + $0x11] sm:$0xff]  ;;  %v67_v20 = vsel %vm64_vm2, %v65_v6, %v66_v14  ;;  %110 = vst.msk [vmem:[#allocation2 + $0x8] sm:$0xff] %vm48_vm0, %v106_v17  ;;  %v109_v21 = vld [vmem:[#allocation3 + $0x19] sm:$0x7f]  ;;  %v132_v22 = vld [vmem:[#allocation6 + $0x48] sm:$0xff] }
  0x24   :  { %169 = vmatpush1.msra.mxu0 %v136_v9  ;;  %320 = vmatpush1.msra.mxu1 %v136_v9  ;;  %112 = vst.msk [vmem:[#allocation2 + $0x18] sm:$0x7f] %vm111_vm3, %v107_v18  ;;  %114 = vst.msk [vmem:[#allocation2 + $0x38] sm:$0x7f] %vm111_vm3, %v109_v21  ;;  %v131_v24 = vld [vmem:[#allocation6 + $0x40] sm:$0xff]  ;;  %v130_v25 = vld [vmem:[#allocation6 + $0x38] sm:$0xff] }
  0x25   :  { %170 = vmatprep.subr.mxu0 %v419_v0  ;;  %297 = vmatprep.subr.mxu1 %v419_v0  ;;  %113 = vst.msk [vmem:[#allocation2 + $0x28] sm:$0xff] %vm48_vm0, %v108_v19  ;;  %78 = vst.msk [vmem:[#allocation2 + $0x10] sm:$0xff] %vm48_vm0, %v67_v20  ;;  %v70_v23 = vsel %vm64_vm2, %v68_v7, %v69_v16  ;;  %v129_v26 = vld [vmem:[#allocation6 + $0x30] sm:$0xff]  ;;  %v128_v27 = vld [vmem:[#allocation6 + $0x28] sm:$0xff] }
  0x26   :  { %171 = vmatpush1.msra.mxu0 %v135_v10  ;;  %321 = vmatpush1.msra.mxu1 %v135_v10  ;;  %80 = vst.msk [vmem:[#allocation2 + $0x30] sm:$0xff] %vm48_vm0, %v70_v23  ;;  %v127_v28 = vld [vmem:[#allocation6 + $0x20] sm:$0xff]  ;;  %v126_v29 = vld [vmem:[#allocation6 + $0x18] sm:$0xff]  ;;  %v125_v30 = vld [vmem:[#allocation6 + $0x10] sm:$0xff] }
  0x27   :  { %172 = vmatprep.subr.mxu0 %v419_v0  ;;  %298 = vmatprep.subr.mxu1 %v419_v0  ;;  %v124_v31 = vld [vmem:[#allocation6 + $0x8] sm:$0xff]  ;;  %v123_v32 = vld [vmem:[#allocation6] sm:$0xff]  ;;  %v146_v33 = vld [vmem:[#allocation6 + $0xb8] sm:$0xff] }
  0x28   :  { %173 = vmatpush1.msra.mxu0 %v134_v11  ;;  %322 = vmatpush1.msra.mxu1 %v134_v11  ;;  %v145_v34 = vld [vmem:[#allocation6 + $0xb0] sm:$0xff]  ;;  %v144_v35 = vld [vmem:[#allocation6 + $0xa8] sm:$0xff]  ;;  %v143_v36 = vld [vmem:[#allocation6 + $0xa0] sm:$0xff] }
  0x29   :  { %174 = vmatprep.subr.mxu0 %v419_v0  ;;  %299 = vmatprep.subr.mxu1 %v419_v0  ;;  %v142_v37 = vld [vmem:[#allocation6 + $0x98] sm:$0xff]  ;;  %v141_v38 = vld [vmem:[#allocation6 + $0x90] sm:$0xff]  ;;  %v140_v40 = vld [vmem:[#allocation6 + $0x88] sm:$0xff] }
  0x2a   :  { %175 = vmatpush1.msra.mxu0 %v133_v13  ;;  %323 = vmatpush1.msra.mxu1 %v133_v13  ;;  %v116_v39 = vld [vmem:[#allocation2 + $0x8] sm:$0xff]  ;;  %v139_v41 = vld [vmem:[#allocation6 + $0x80] sm:$0xff] }
  0x2b   :  { %176 = vmatprep.subr.mxu0 %v419_v0  ;;  %300 = vmatprep.subr.mxu1 %v419_v0  ;;  %v118_v47 = vld [vmem:[#allocation2 + $0x18] sm:$0xff]  ;;  %v288_v53 = vld [vmem:[%s540_s2] ss:$0 sm:$0xff]  ;;  %v293_v55 = vld [vmem:[%s540_s2 + $0x1] ss:$0 sm:$0xff]  ;;  %s421_s2 = smov [#allocation8]  }
  0x2c   :  { %177 = vmatpush1.msra.mxu0 %v132_v22  ;;  %324 = vmatpush1.msra.mxu1 %v132_v22  ;;  %v120_v42 = vld [vmem:[#allocation2 + $0x28] sm:$0xff]  ;;  %v122_v50 = vld [vmem:[#allocation2 + $0x38] sm:$0xff]  ;;  %s275_s27 = sshll.u32 %s421_s2, 4  ;;  %s276_s27 = int_to_ptr.vmem [resolvable:$true] %s275_s27 }
  0x2d   :  { %178 = vmatprep.subr.mxu0 %v419_v0  ;;  %301 = vmatprep.subr.mxu1 %v419_v0  ;;  %s389_s28 = scalar_lea.vmem %s276_s27, 512  ;;  %p394_p11 = scmp.lt.s32.totalorder %s276_s27, %s276_s27 }
  0x2e   :  { %179 = vmatpush1.msra.mxu0 %v131_v24  ;;  %325 = vmatpush1.msra.mxu1 %v131_v24  ;;  %p390_p10 = scmp.ne.s32.totalorder %s276_s27, %s389_s28  ;;  %p395_p12 = scmp.lt.s32.totalorder %s389_s28, %s389_s28 }
  0x2f   :  { %180 = vmatprep.subr.mxu0 %v419_v0  ;;  %302 = vmatprep.subr.mxu1 %v419_v0 }
  0x30   :  { %181 = vmatpush1.msra.mxu0 %v130_v25  ;;  %326 = vmatpush1.msra.mxu1 %v130_v25  ;;  %p396_p13 = por %p395_p12, %p394_p11 }
  0x31   :  { %182 = vmatprep.subr.mxu0 %v419_v0  ;;  %303 = vmatprep.subr.mxu1 %v419_v0 }
  0x32   :  { %183 = vmatpush1.msra.mxu0 %v129_v26  ;;  %327 = vmatpush1.msra.mxu1 %v129_v26  ;;  %p397_p0 = pnand %p396_p13, %p390_p10 }
  0x33   :  { %184 = vmatprep.subr.mxu0 %v419_v0  ;;  %304 = vmatprep.subr.mxu1 %v419_v0 }
  0x34   :  { %185 = vmatpush1.msra.mxu0 %v128_v27  ;;  %328 = vmatpush1.msra.mxu1 %v128_v27 }
  0x35   :  { %186 = vmatprep.subr.mxu0 %v419_v0  ;;  %305 = vmatprep.subr.mxu1 %v419_v0 }
  0x36   :  { %187 = vmatpush1.msra.mxu0 %v127_v28  ;;  %329 = vmatpush1.msra.mxu1 %v127_v28 }
  0x37   :  { %188 = vmatprep.subr.mxu0 %v419_v0  ;;  %306 = vmatprep.subr.mxu1 %v419_v0 }
  0x38   :  { %189 = vmatpush1.msra.mxu0 %v126_v29  ;;  %330 = vmatpush1.msra.mxu1 %v126_v29 }
  0x39   :  { %190 = vmatprep.subr.mxu0 %v419_v0  ;;  %307 = vmatprep.subr.mxu1 %v419_v0 }
  0x3a   :  { %191 = vmatpush1.msra.mxu0 %v125_v30  ;;  %331 = vmatpush1.msra.mxu1 %v125_v30 }
  0x3b   :  { %192 = vmatprep.subr.mxu0 %v419_v0  ;;  %308 = vmatprep.subr.mxu1 %v419_v0 }
  0x3c   :  { %193 = vmatpush1.msra.mxu0 %v124_v31  ;;  %332 = vmatpush1.msra.mxu1 %v124_v31 }
  0x3d   :  { %194 = vmatprep.subr.mxu0 %v419_v0  ;;  %309 = vmatprep.subr.mxu1 %v419_v0 }
  0x3e   :  { %195 = vmatpush1.msra.mxu0 %v123_v32  ;;  %333 = vmatpush1.msra.mxu1 %v123_v32 }
  0x3f   :  { %212 = vmatprep.subr.mxu0 %v419_v0  ;;  %310 = vmatprep.subr.mxu1 %v419_v0 }
  0x40   :  { %213 = vmatpush2.msra.mxu0 %v146_v33  ;;  %334 = vmatpush2.msra.mxu1 %v146_v33 }
  0x41   :  { %214 = vmatprep.subr.mxu0 %v419_v0  ;;  %311 = vmatprep.subr.mxu1 %v419_v0 }
  0x42   :  { %215 = vmatpush2.msra.mxu0 %v145_v34  ;;  %335 = vmatpush2.msra.mxu1 %v145_v34 }
  0x43   :  { %216 = vmatprep.subr.mxu0 %v419_v0  ;;  %312 = vmatprep.subr.mxu1 %v419_v0 }
  0x44   :  { %217 = vmatpush2.msra.mxu0 %v144_v35  ;;  %336 = vmatpush2.msra.mxu1 %v144_v35 }
  0x45   :  { %218 = vmatprep.subr.mxu0 %v419_v0  ;;  %313 = vmatprep.subr.mxu1 %v419_v0 }
  0x46   :  { %219 = vmatpush2.msra.mxu0 %v143_v36  ;;  %337 = vmatpush2.msra.mxu1 %v143_v36 }
  0x47   :  { %220 = vmatprep.subr.mxu0 %v419_v0  ;;  %314 = vmatprep.subr.mxu1 %v419_v0 }
  0x48   :  { %221 = vmatpush2.msra.mxu0 %v142_v37  ;;  %338 = vmatpush2.msra.mxu1 %v142_v37 }
  0x49   :  { %222 = vmatprep.subr.mxu0 %v419_v0  ;;  %315 = vmatprep.subr.mxu1 %v419_v0 }
  0x4a   :  { %223 = vmatpush2.msra.mxu0 %v141_v38  ;;  %339 = vmatpush2.msra.mxu1 %v141_v38 }
  0x4b   :  { %224 = vmatprep.subr.mxu0 %v419_v0  ;;  %289 = vmatprep.mubr.msk.f32.mxu0 %vm48_vm0, %v116_v39 }
  0x4c   :  { %225 = vmatpush2.msra.mxu0 %v140_v40  ;;  %316 = vmatprep.subr.mxu1 %v419_v0 }
  0x4d   :  { %226 = vmatprep.subr.mxu0 %v419_v0  ;;  %340 = vmatpush2.msra.mxu1 %v140_v40 }
  0x4e   :  { %227 = vmatpush2.msra.mxu0 %v139_v41  ;;  %317 = vmatprep.subr.mxu1 %v419_v0 }
  0x4f   :  { %341 = vmatpush2.msra.mxu1 %v139_v41  ;;  %291 = vmatprep.mubr.msk.f32.mxu1 %vm48_vm0, %v120_v42 }
  0x90   :  { %v90_v43 = vpop.permute.xlu0 %89  ;;  %v92_v44 = vpop.permute.xlu1 %91 }
  0x91   :  { %102 = vst.msk [vmem:[#allocation2] sm:$0xff] %vm101_vm4, %v90_v43  ;;  %103 = vst.msk [vmem:[#allocation2 + $0x10] sm:$0xff] %vm101_vm4, %v92_v44 }
  0x94   :  { %v94_v45 = vpop.permute.xlu0 %93  ;;  %v96_v46 = vpop.permute.xlu1 %95 }
  0x95   :  { %104 = vst.msk [vmem:[#allocation2 + $0x20] sm:$0xff] %vm101_vm4, %v94_v45  ;;  %105 = vst.msk [vmem:[#allocation2 + $0x30] sm:$0xff] %vm101_vm4, %v96_v46 }
  0x98   :  { %v115_v48 = vld [vmem:[#allocation2] sm:$0xff]  ;;  %v117_v49 = vld [vmem:[#allocation2 + $0x10] sm:$0xff] }
  0x99   :  { %229 = vmatmul.mubr.f32.vlgmr.msra.gmra.mxu0 %v115_v48 }
  0x9a   :  { %290 = vmatprep.mubr.msk.f32.mxu0 %vm48_vm0, %v118_v47 }
  0x9c   :  { %v119_v51 = vld [vmem:[#allocation2 + $0x20] sm:$0xff]  ;;  %v121_v52 = vld [vmem:[#allocation2 + $0x30] sm:$0xff] }
  0x9d   :  { %234 = vmatmul.mubr.f32.gmra.mxu0 %v117_v49  ;;  %239 = vmatmul.mubr.f32.vlgmr.msra.gmra.mxu1 %v119_v51 }
  0x9e   :  { %292 = vmatprep.mubr.msk.f32.mxu1 %vm48_vm0, %v122_v50 }
  0xa1   :  { %244 = vmatmul.mubr.f32.gmra.mxu1 %v121_v52 }
 0x159   :  { %v230_v54 = vpop.f32.mrf.mxu0 }
 0x15a   :  { %v231_v56 = vadd.f32 %v288_v53, %v230_v54 }
 0x15b   :  { %v232_v57 = vpop.f32.mrf.mxu0 }
 0x15c   :  { %vm249_vm5 = vcmp.gt.f32.partialorder %v231_v56, 0.0  ;;  %v258_v58 = vmul.f32 %v293_v55, %v231_v56 }
 0x15d   :  { %v235_v59 = vpop.f32.mrf.mxu0  ;;  %v240_v60 = vpop.f32.mrf.mxu1 }
 0x15e   :  { %v262_v61 = vsel %vm249_vm5, %v231_v56, %v258_v58  ;;  %v236_v62 = vadd.f32 %v288_v53, %v235_v59  ;;  %v241_v63 = vadd.f32 %v288_v53, %v240_v60 }
 0x15f   :  { %266 = vst [vmem:[#allocation8] sm:$0xff] %v262_v61  ;;  %v237_v0 = vpop.f32.mrf.mxu0  ;;  %v242_v1 = vpop.f32.mrf.mxu1 }
 0x160   :  { %vm250_vm6 = vcmp.gt.f32.partialorder %v236_v62, 0.0  ;;  %v259_v2 = vmul.f32 %v293_v55, %v236_v62  ;;  %vm251_vm7 = vcmp.gt.f32.partialorder %v241_v63, 0.0  ;;  %v260_v3 = vmul.f32 %v293_v55, %v241_v63 }
 0x161   :  { %v245_v4 = vpop.f32.mrf.mxu1 }
 0x162   :  { %v263_v5 = vsel %vm250_vm6, %v236_v62, %v259_v2  ;;  %v264_v6 = vsel %vm251_vm7, %v241_v63, %v260_v3  ;;  %v246_v7 = vadd.f32 %v288_v53, %v245_v4 }
 0x163   :  { %267 = vst [vmem:[#allocation8 + $0x8] sm:$0xff] %v263_v5  ;;  %268 = vst [vmem:[#allocation8 + $0x10] sm:$0xff] %v264_v6  ;;  %v247_v8 = vpop.f32.mrf.mxu1 }
 0x164   :  { %vm252_vm8 = vcmp.gt.f32.partialorder %v246_v7, 0.0  ;;  %v261_v9 = vmul.f32 %v293_v55, %v246_v7 }
 0x166   :  { %v265_v10 = vsel %vm252_vm8, %v246_v7, %v261_v9 }
 0x167   :  { %269 = vst [vmem:[#allocation8 + $0x18] sm:$0xff] %v265_v10 }
 0x168   :  { %400 = shalt.err (!%p397_p0)
}
 0x169   :  { %281 = dma.vmem_to_hbm [thread:$0]  %s276_s27, 512, %s541_s3, [#allocation5], %s416_s15, %s416_s15, %s417_s16  }
 0x16a   :  { %413 = dma.done.wait [#allocation5], 512  }
 0x16b   :  { %414 = vsyncadd [#allocation5], 4294966784 }
 0x16c   :  { %285 = vsyncpa [#allocation4], 1 }
 0x16d   :  { %286 = vsyncpa [#allocation7], 1 }
 0x16e   :  { %287 = vsyncpa [#allocation5], 1 }

</bundles_post_ra>
